<compile_context>
chip_gen: v7x
topology: tpu7x:2x2x1
jax: 0.10.0
libtpu: 0.0.40
codegen_flags: <defaults>
</compile_context>

<pallas_src>
import jax
import jax.numpy as jnp
from jax.experimental import pallas as pl
from jax.experimental.pallas import tpu as pltpu

BN_EPS = 1e-5
DEFAULT_TILE_ROWS = 8192                 # per-step overhead amortized; fits VMEM budget
VMEM_LIMIT_BYTES = 48 * 1024 * 1024      # < 64 MiB physical on v7x; roomy on v5e/v6e


def _round_up(n, m):
    return (n + m - 1) // m * m


def _cdiv(a, b):
    return -(-a // b)


def _apply_chain(x, wb_refs, relu_last, compute_dtype=jnp.float32):
    """Apply len(wb_refs)//2 dense layers.  All but (optionally) the last are
    BN-folded conv + ReLU; the last is left pre-activation when relu_last=False.
    Matmuls run in compute_dtype with f32 accumulation; the returned h is f32."""
    n = len(wb_refs) // 2
    h = x.astype(compute_dtype)
    for i in range(n):
        w = wb_refs[2 * i][...].astype(compute_dtype)
        b = wb_refs[2 * i + 1][...]
        h = jnp.dot(h, w, preferred_element_type=jnp.float32) + b
        if relu_last or i < n - 1:
            h = jnp.maximum(h, 0.0)
        if i < n - 1:
            h = h.astype(compute_dtype)
    return h


def _make_stats_kernel(n_layers, n_valid, tile_rows, inner_tiles, stats_dtype):
    """Accumulate per-channel sum and sum-of-squares of the last conv's pre-BN
    output over all valid (non-padded) rows.  Earlier layers are BN-folded.
    Grid is (core, tile): the leading axis is 'parallel' so v7x's two TensorCores
    each own one accumulator block; partial sums are combined in XLA afterwards."""

    def kernel(x_ref, *refs):
        wb = refs[: 2 * n_layers]
        s_ref, q_ref = refs[2 * n_layers:]
        c = pl.program_id(0)
        i = pl.program_id(1)

        @pl.when(i == 0)
        def _init():
            s_ref[...] = jnp.zeros_like(s_ref)
            q_ref[...] = jnp.zeros_like(q_ref)

        h = _apply_chain(x_ref[...], wb, relu_last=False, compute_dtype=stats_dtype)

        # Row-validity mask (masks zero-padded rows); only sublane 0 is "live" so the
        # MXU dot produces the per-channel sum in row 0 and zeros elsewhere.  Reducing
        # through the MXU keeps the long cross-sublane sum off the VPU/XLU.
        tile_idx = c * inner_tiles + i
        col = jax.lax.broadcasted_iota(jnp.int32, (8, tile_rows), 1)
        sub = jax.lax.broadcasted_iota(jnp.int32, (8, tile_rows), 0)
        grow = tile_idx * tile_rows + col
        valid = jnp.logical_and(sub == 0, grow < n_valid).astype(jnp.float32)

        s_ref[...] += jnp.dot(valid, h, preferred_element_type=jnp.float32)[None]
        q_ref[...] += jnp.dot(valid, h * h, preferred_element_type=jnp.float32)[None]

    return kernel


def _make_output_kernel(n_layers):
    def kernel(x_ref, *refs):
        wb = refs[: 2 * n_layers]
        o_ref = refs[-1]
        o_ref[...] = _apply_chain(x_ref[...], wb, relu_last=True).astype(o_ref.dtype)

    return kernel


def _stats_pass(x2d, wb, stats_width, tile, num_tiles, n_valid, stats_dtype):
    n_layers = len(wb) // 2
    inner = num_tiles // 2
    kernel = _make_stats_kernel(n_layers, n_valid, tile, inner, stats_dtype)
    s, q = pl.pallas_call(
        kernel,
        out_shape=[jax.ShapeDtypeStruct((2, 8, stats_width), jnp.float32)] * 2,
        grid=(2, inner),
        in_specs=[pl.BlockSpec((tile, x2d.shape[1]), lambda c, i: (c * inner + i, 0))]
        + [pl.BlockSpec(p.shape, lambda c, i: (0, 0)) for p in wb],
        out_specs=[pl.BlockSpec((1, 8, stats_width), lambda c, i: (c, 0, 0))] * 2,
        compiler_params=pltpu.CompilerParams(
            dimension_semantics=("parallel", "arbitrary"),  # core-split x reduction
            vmem_limit_bytes=VMEM_LIMIT_BYTES,
        ),
    )(x2d, *wb)
    # Combine the two per-core partials (rows 1..7 are zero by construction).
    s = jnp.sum(s, axis=(0, 1))[None, :]
    q = jnp.sum(q, axis=(0, 1))[None, :]
    return s, q


def _output_pass(x2d, wb, out_width, tile, num_tiles):
    n_layers = len(wb) // 2
    kernel = _make_output_kernel(n_layers)
    return pl.pallas_call(
        kernel,
        out_shape=jax.ShapeDtypeStruct((x2d.shape[0], out_width), jnp.float32),
        grid=(num_tiles,),
        in_specs=[pl.BlockSpec((tile, x2d.shape[1]), lambda i: (i, 0))]
        + [pl.BlockSpec(p.shape, lambda i: (0, 0)) for p in wb],
        out_specs=pl.BlockSpec((tile, out_width), lambda i: (i, 0)),
        compiler_params=pltpu.CompilerParams(
            dimension_semantics=("parallel",),        # independent row tiles (megacore)
            vmem_limit_bytes=VMEM_LIMIT_BYTES,
        ),
    )(x2d, *wb)


def _bn_fold(s, q, n, w, b, gamma, beta):
    """Turn accumulated (sum, sum_sq) into BN scale/shift and fold into the conv:
    relu(((x@w + b) - mean) * rstd * gamma + beta) == relu(x @ (w*scale) + (b*scale + shift))."""
    mean = s / n
    var = jnp.maximum(q / n - mean * mean, 0.0)
    scale = gamma * jax.lax.rsqrt(var + BN_EPS)
    shift = beta - mean * scale
    return w * scale, b * scale + shift


def ts_encoder_forward(x, bmask, params, *, tile_rows=DEFAULT_TILE_ROWS,
                       stats_dtype=jnp.float32):
    """x: (B, T, C_in) float32 (may contain NaNs).  bmask: (B, T) bool (binomial mask).
    Returns (B, T, output_size), matching PyTorch TSEncoder.forward (BatchNorm in
    training mode, i.e. batch statistics over B*T)."""
    B, T, Cin = x.shape
    Cout = params["w3"].shape[1]
    N = B * T

    # --- NaN-row + binomial masking done in XLA (fused for free); the kernels never
    #     see a lane-padded (N, 1) mask input.
    x = x.astype(jnp.float32)
    nan_row = jnp.any(jnp.isnan(x), axis=-1, keepdims=True)
    keep = jnp.logical_and(bmask[..., None], jnp.logical_not(nan_row))
    x2d = jnp.where(keep, x, 0.0).reshape(N, Cin)

    # --- adaptive tile: num_tiles even (>= 2, feeds both v7x cores) and the tile sized
    #     so n_pad stays within one 8-row quantum per tile of N (no wasted DMA/compute).
    num_tiles = max(2, _cdiv(N, tile_rows))
    if num_tiles % 2:
        num_tiles += 1
    tile = _round_up(_cdiv(N, num_tiles), 8)
    n_pad = tile * num_tiles
    if n_pad != N:
        x2d = jnp.pad(x2d, ((0, n_pad - N), (0, 0)))

    w1, b1 = params["w1"], params["b1"]
    w2, b2 = params["w2"], params["b2"]
    w3, b3 = params["w3"], params["b3"]
    c1, c2 = w1.shape[1], w2.shape[1]

    # Pass 1: global stats of conv1 output -> fold BN1 into conv1.
    s1, q1 = _stats_pass(x2d, [w1, b1], c1, tile, num_tiles, N, stats_dtype)
    fw1, fb1 = _bn_fold(s1, q1, N, w1, b1, params["g1"], params["be1"])
    # Pass 2: global stats of conv2 output (conv1+BN1 folded) -> fold BN2.
    s2, q2 = _stats_pass(x2d, [fw1, fb1, w2, b2], c2, tile, num_tiles, N, stats_dtype)
    fw2, fb2 = _bn_fold(s2, q2, N, w2, b2, params["g2"], params["be2"])
    # Pass 3: global stats of conv3 output -> fold BN3.
    s3, q3 = _stats_pass(x2d, [fw1, fb1, fw2, fb2, w3, b3], Cout, tile, num_tiles, N,
                         stats_dtype)
    fw3, fb3 = _bn_fold(s3, q3, N, w3, b3, params["g3"], params["be3"])
    # Pass 4: fused conv+BN+ReLU chain; output written Cout-wide (no lane padding).
    out = _output_pass(x2d, [fw1, fb1, fw2, fb2, fw3, fb3], Cout, tile, num_tiles)

    if n_pad != N:
        out = out[:N]
    return out.reshape(B, T, Cout)


def _reference_forward(x, bmask, params):
    # Pure-JAX reference mirroring PyTorch semantics (for validation).
    x = x.astype(jnp.float32)
    nan_row = jnp.any(jnp.isnan(x), axis=-1, keepdims=True)
    keep = jnp.logical_and(bmask[..., None], jnp.logical_not(nan_row))
    x = jnp.where(keep, x, 0.0)
    B, T, _ = x.shape
    h = x.reshape(B * T, -1)

    def bn_relu(h, g, b):
        mu = jnp.mean(h, axis=0, keepdims=True)
        var = jnp.mean((h - mu) ** 2, axis=0, keepdims=True)
        return jnp.maximum((h - mu) * jax.lax.rsqrt(var + BN_EPS) * g + b, 0.0)

    h = bn_relu(h @ params["w1"] + params["b1"], params["g1"], params["be1"])
    h = bn_relu(h @ params["w2"] + params["b2"], params["g2"], params["be2"])
    h = bn_relu(h @ params["w3"] + params["b3"], params["g3"], params["be3"])
    return h.reshape(B, T, -1)


def _init_params(key, input_size, output_size):
    # Deterministic synthetic parameters (conv kernel_size=1 weights stored
    # pre-transposed as (C_in, C_out); BN gamma/beta per channel).
    dims = [(input_size, 128), (128, 64), (64, output_size)]
    params = {}
    keys = jax.random.split(key, 12)
    for i, (cin, cout) in enumerate(dims, start=1):
        k0, k1, k2, k3 = keys[(i - 1) * 4: i * 4]
        scale = 1.0 / jnp.sqrt(jnp.float32(cin))
        params[f"w{i}"] = jax.random.normal(k0, (cin, cout), jnp.float32) * scale
        params[f"b{i}"] = jax.random.normal(k1, (1, cout), jnp.float32) * 0.1
        params[f"g{i}"] = 1.0 + 0.1 * jax.random.normal(k2, (1, cout), jnp.float32)
        params[f"be{i}"] = 0.1 * jax.random.normal(k3, (1, cout), jnp.float32)
    return params


if __name__ == "__main__":
    key = jax.random.PRNGKey(0)
    B, T = 2, 16
    input_size, output_size = 8, 32

    k_x, k_mask, k_params = jax.random.split(key, 3)
    x = jax.random.normal(k_x, (B, T, input_size), jnp.float32)
    # inject NaNs to exercise the nan-masking path
    x = x.at[0, 3, 2].set(jnp.nan)
    x = x.at[1, 7, 0].set(jnp.nan)

    # generate_binomial_mask(B, T, p=0.5) -- deterministic Bernoulli here
    bmask = jax.random.bernoulli(k_mask, 0.5, (B, T))

    params = _init_params(k_params, input_size, output_size)

    out = ts_encoder_forward(x, bmask, params)
    out = jax.block_until_ready(out)

    ref = _reference_forward(x, bmask, params)
    assert out.shape == (B, T, output_size)
    assert bool(jnp.all(jnp.isfinite(out)))
    assert jnp.allclose(out, ref, atol=1e-4, rtol=1e-4)

    print("KERNEL_OK")
</pallas_src>

<mosaic_0001>
module attributes {stable_mosaic.version = 11 : i64} {
  func.func @kernel(%arg0: i32, %arg1: i32, %arg2: memref<16x8xf32, #tpu.memory_space<vmem>>, %arg3: memref<8x128xf32, #tpu.memory_space<vmem>>, %arg4: memref<1x128xf32, #tpu.memory_space<vmem>>, %arg5: memref<1x8x128xf32, #tpu.memory_space<vmem>>, %arg6: memref<1x8x128xf32, #tpu.memory_space<vmem>>) attributes {dimension_semantics = [#tpu.dimension_semantics<parallel>, #tpu.dimension_semantics<arbitrary>], iteration_bounds = array<i64: 2, 1>, scalar_prefetch = 0 : i64, scratch_operands = 0 : i64, tpu.core_type = #tpu.core_type<tc>, window_params = [{transform_indices = @transform_0, window_bounds = array<i64: 16, 8>}, {pipeline_mode = #tpu.pipeline_mode<synchronous>, transform_indices = @transform_1, window_bounds = array<i64: 8, 128>}, {pipeline_mode = #tpu.pipeline_mode<synchronous>, transform_indices = @transform_2, window_bounds = array<i64: 1, 128>}, {transform_indices = @transform_3, window_bounds = array<i64: 1, 8, 128>}, {transform_indices = @transform_4, window_bounds = array<i64: 1, 8, 128>}]} {
    %c0_i32 = arith.constant 0 : i32
    %0 = arith.cmpi eq, %arg1, %c0_i32 : i32
    %1 = arith.extui %0 : i1 to i32
    %c0_i32_0 = arith.constant 0 : i32
    %2 = arith.cmpi ne, %1, %c0_i32_0 : i32
    scf.if %2 {
      %cst_21 = arith.constant 0.000000e+00 : f32
      %34 = vector.broadcast %cst_21 : f32 to vector<1x8x128xf32>
      %c0_22 = arith.constant 0 : index
      %c0_23 = arith.constant 0 : index
      %c0_24 = arith.constant 0 : index
      %35 = vector.load %arg5[%c0_22, %c0_23, %c0_24] : memref<1x8x128xf32, #tpu.memory_space<vmem>>, vector<1x8x128xf32>
      tpu.vector_store %arg5[%c0_22, %c0_23, %c0_24], %34 {strides = array<i32>} : memref<1x8x128xf32, #tpu.memory_space<vmem>>, vector<1x8x128xf32>,
      %cst_25 = arith.constant 0.000000e+00 : f32
      %36 = vector.broadcast %cst_25 : f32 to vector<1x8x128xf32>
      %c0_26 = arith.constant 0 : index
      %c0_27 = arith.constant 0 : index
      %c0_28 = arith.constant 0 : index
      %37 = vector.load %arg6[%c0_26, %c0_27, %c0_28] : memref<1x8x128xf32, #tpu.memory_space<vmem>>, vector<1x8x128xf32>
      tpu.vector_store %arg6[%c0_26, %c0_27, %c0_28], %36 {strides = array<i32>} : memref<1x8x128xf32, #tpu.memory_space<vmem>>, vector<1x8x128xf32>,
    } else {
    }
    %c0 = arith.constant 0 : index
    %c0_1 = arith.constant 0 : index
    %3 = vector.load %arg2[%c0, %c0_1] : memref<16x8xf32, #tpu.memory_space<vmem>>, vector<16x8xf32>
    %c0_2 = arith.constant 0 : index
    %c0_3 = arith.constant 0 : index
    %4 = vector.load %arg3[%c0_2, %c0_3] : memref<8x128xf32, #tpu.memory_space<vmem>>, vector<8x128xf32>
    %c0_4 = arith.constant 0 : index
    %c0_5 = arith.constant 0 : index
    %5 = vector.load %arg4[%c0_4, %c0_5] : memref<1x128xf32, #tpu.memory_space<vmem>>, vector<1x128xf32>
    %cst = arith.constant dense<0.000000e+00> : vector<16x128xf32>
    %6 = tpu.matmul %3, %4, %cst {dimension_numbers = #tpu.dot_dimension_numbers<[1], [0], [0], [1], [0, 0, 1, 1], [], []>} : vector<16x8xf32>, vector<8x128xf32>, vector<16x128xf32> -> vector<16x128xf32>
    %7 = vector.broadcast %5 : vector<1x128xf32> to vector<16x128xf32>
    %8 = arith.addf %6, %7 : vector<16x128xf32>
    %c1_i32 = arith.constant 1 : i32
    %9 = arith.muli %arg0, %c1_i32 : i32
    %10 = arith.addi %9, %arg1 : i32
    %11 = tpu.iota {dimensions = array<i32: 1>} : vector<8x16xi32>
    %12 = tpu.iota {dimensions = array<i32: 0>} : vector<8x16xi32>
    %c16_i32 = arith.constant 16 : i32
    %13 = arith.muli %10, %c16_i32 : i32
    %14 = vector.broadcast %13 : i32 to vector<8x16xi32>
    %15 = arith.addi %14, %11 : vector<8x16xi32>
    %c0_i32_6 = arith.constant 0 : i32
    %16 = vector.broadcast %c0_i32_6 : i32 to vector<8x16xi32>
    %17 = arith.cmpi eq, %12, %16 : vector<8x16xi32>
    %c32_i32 = arith.constant 32 : i32
    %18 = vector.broadcast %c32_i32 : i32 to vector<8x16xi32>
    %19 = arith.cmpi slt, %15, %18 : vector<8x16xi32>
    %20 = arith.andi %17, %19 : vector<8x16xi1>
    %21 = arith.extui %20 : vector<8x16xi1> to vector<8x16xi32>
    %22 = arith.sitofp %21 : vector<8x16xi32> to vector<8x16xf32>
    %c0_7 = arith.constant 0 : index
    %c0_8 = arith.constant 0 : index
    %c0_9 = arith.constant 0 : index
    %23 = vector.load %arg5[%c0_7, %c0_8, %c0_9] : memref<1x8x128xf32, #tpu.memory_space<vmem>>, vector<1x8x128xf32>
    %cst_10 = arith.constant dense<0.000000e+00> : vector<8x128xf32>
    %24 = tpu.matmul %22, %8, %cst_10 {dimension_numbers = #tpu.dot_dimension_numbers<[1], [0], [0], [1], [0, 0, 1, 1], [], []>} : vector<8x16xf32>, vector<16x128xf32>, vector<8x128xf32> -> vector<8x128xf32>
    %25 = vector.shape_cast %24 : vector<8x128xf32> to vector<1x8x128xf32>
    %26 = arith.addf %23, %25 : vector<1x8x128xf32>
    %c0_11 = arith.constant 0 : index
    %c0_12 = arith.constant 0 : index
    %c0_13 = arith.constant 0 : index
    %27 = vector.load %arg5[%c0_11, %c0_12, %c0_13] : memref<1x8x128xf32, #tpu.memory_space<vmem>>, vector<1x8x128xf32>
    tpu.vector_store %arg5[%c0_11, %c0_12, %c0_13], %26 {strides = array<i32>} : memref<1x8x128xf32, #tpu.memory_space<vmem>>, vector<1x8x128xf32>,
    %c0_14 = arith.constant 0 : index
    %c0_15 = arith.constant 0 : index
    %c0_16 = arith.constant 0 : index
    %28 = vector.load %arg6[%c0_14, %c0_15, %c0_16] : memref<1x8x128xf32, #tpu.memory_space<vmem>>, vector<1x8x128xf32>
    %29 = arith.mulf %8, %8 : vector<16x128xf32>
    %cst_17 = arith.constant dense<0.000000e+00> : vector<8x128xf32>
    %30 = tpu.matmul %22, %29, %cst_17 {dimension_numbers = #tpu.dot_dimension_numbers<[1], [0], [0], [1], [0, 0, 1, 1], [], []>} : vector<8x16xf32>, vector<16x128xf32>, vector<8x128xf32> -> vector<8x128xf32>
    %31 = vector.shape_cast %30 : vector<8x128xf32> to vector<1x8x128xf32>
    %32 = arith.addf %28, %31 : vector<1x8x128xf32>
    %c0_18 = arith.constant 0 : index
    %c0_19 = arith.constant 0 : index
    %c0_20 = arith.constant 0 : index
    %33 = vector.load %arg6[%c0_18, %c0_19, %c0_20] : memref<1x8x128xf32, #tpu.memory_space<vmem>>, vector<1x8x128xf32>
    tpu.vector_store %arg6[%c0_18, %c0_19, %c0_20], %32 {strides = array<i32>} : memref<1x8x128xf32, #tpu.memory_space<vmem>>, vector<1x8x128xf32>,
    return
  }
  func.func @transform_0(%arg0: i32, %arg1: i32) -> (i32, i32) {
    %c1_i32 = arith.constant 1 : i32
    %0 = arith.muli %arg0, %c1_i32 : i32
    %1 = arith.addi %0, %arg1 : i32
    %c0_i32 = arith.constant 0 : i32
    %c0_i32_0 = arith.constant 0 : i32
    return %1, %c0_i32 : i32, i32
  }
  func.func @transform_1(%arg0: i32, %arg1: i32) -> (i32, i32) {
    %c0_i32 = arith.constant 0 : i32
    %c0_i32_0 = arith.constant 0 : i32
    %c0_i32_1 = arith.constant 0 : i32
    return %c0_i32, %c0_i32_0 : i32, i32
  }
  func.func @transform_2(%arg0: i32, %arg1: i32) -> (i32, i32) {
    %c0_i32 = arith.constant 0 : i32
    %c0_i32_0 = arith.constant 0 : i32
    %c0_i32_1 = arith.constant 0 : i32
    return %c0_i32, %c0_i32_0 : i32, i32
  }
  func.func @transform_3(%arg0: i32, %arg1: i32) -> (i32, i32, i32) {
    %c0_i32 = arith.constant 0 : i32
    %c0_i32_0 = arith.constant 0 : i32
    %c0_i32_1 = arith.constant 0 : i32
    return %arg0, %c0_i32, %c0_i32_0 : i32, i32, i32
  }
  func.func @transform_4(%arg0: i32, %arg1: i32) -> (i32, i32, i32) {
    %c0_i32 = arith.constant 0 : i32
    %c0_i32_0 = arith.constant 0 : i32
    %c0_i32_1 = arith.constant 0 : i32
    return %arg0, %c0_i32, %c0_i32_0 : i32, i32, i32
  }
}

</mosaic_0001>

<bundles_post_ra>
// kernel: tpu_custom_call.1
= control target key start
LH: loop header
LB: loop body
LE: loop exit
PB: predicated region body
PF: predicated region fallthrough
CT: control target
= control target key end

     0   :  { %10 = vsyncpa [#allocation3], 0  ;;  %s1038_s0 = inlined_call_operand.vmem [shape: f32[32,8], index: 0, kind: input, shape index: {}]   ;;  %s1039_s1 = inlined_call_operand.vmem [shape: f32[8,128], index: 1, kind: input, shape index: {}]   ;;  %s1040_s2 = inlined_call_operand.vmem [shape: f32[1,128], index: 2, kind: input, shape index: {}]   ;;  %s1041_s3 = inlined_call_operand.hbm [shape: f32[2,8,128], index: 3, kind: output, shape index: {0}]   ;;  %s1042_s4 = inlined_call_operand.hbm [shape: f32[2,8,128], index: 4, kind: output, shape index: {1}]  }
   0x1   :  { %12 = vsyncpa [#allocation3 + $0x1], 0 }
   0x2   :  { %13 = vsyncpa [#allocation5], 0 }
   0x3   :  { %15 = vsyncpa [#allocation5 + $0x1], 0  ;;  %s883_s15 = smov 0   ;;  %s885_s16 = smov 0  }
   0x4   :  { %s887_s17 = smov 0   ;;  %s889_s18 = smov 0  }
   0x5   :  { %s891_s19 = smov 0   ;;  %s893_s20 = smov 0  }
   0x6 LB: > { %s622_s21 = sadd.s32 4294967295, %s851_s20   ;;  %s623_s22 = sadd.s32 4294967294, %s851_s20   ;;  %s851_s20 = sphi %s893_s20, %s21_s20   ;;  %s847_s19 = sphi %s891_s19, %s1049_s19   ;;  %s843_s18 = sphi %s889_s18, %s1048_s18   ;;  %s839_s17 = sphi %s887_s17, %s1047_s17   ;;  %s835_s16 = sphi %s885_s16, %s1046_s16   ;;  %s831_s15 = sphi %s883_s15, %s1045_s15  }
   0x7   : > { %s33_s23 = sadd.s32 1, %s847_s19  ;;  %s110_s24 = sadd.s32 1, %s839_s17 }
   0x8   : > { %p35_p0 = scmp.ge.s32.totalorder %s33_s23, 2  ;;  %p120_p1 = scmp.ne.s32.totalorder %s839_s17, %s835_s16 }
   0x9   : > { %p121_p2 = scmp.eq.s32.totalorder %s622_s21, 1  ;;  %p126_p3 = scmp.ne.s32.totalorder %s835_s16, %s831_s15 }
   0xa   : > { %s1051_s23 = smov (%p35_p0, %s33_s23), 0  ;;  %p127_p5 = scmp.eq.s32.totalorder %s623_s22, 1 }
   0xb   : > { %p923_p4 = por %p121_p2, %p120_p1  ;;  %s107_s26 = ssub.s32 %s847_s19, %s1051_s23 }
   0xc   : > { %p626_p6 = scmp.ge.s32.totalorder %s851_s20, 1  ;;  %p108_p7 = scmp.eq.s32.totalorder %s107_s26, 0 }
   0xd   : > { %p930_p8 = por %p127_p5, %p126_p3  ;;  %p188_p9 = scmp.lt.s32.totalorder %s851_s20, 3 }
   0xe   : > { %s936_s28 = scalar_select %p108_p7, %s839_s17, %s110_s24  }
   0xf   : > { %p189_p10 = pnand %p626_p6, %p188_p9 }
  0x10   : > { %v236_v0 = vld [vmem:[%s1039_s1] sm:$0xff] (!%p189_p10)  ;;  %s629_s5 = sshll.u32 (!%p189_p10), %s843_s18, 1  ;;  %vm244_vm0 = vcmask (!%p189_p10), 64512   ;;  %v853_v3 = vmov (!%p189_p10), 0.0|0.0   ;;  %vm854_vm1 = vmmov (!%p189_p10), 0   ;;  %v855_v4 = vmov (!%p189_p10), 0.0  }
  0x11   : > { %192 = sbr.rel (%p189_p10) target bundleno = 500 (0x1f4), region = 32  ;;  %653 = vmatprep.subr.mxu0 (!%p189_p10), %v236_v0  ;;  %p222_p11 = scmp.lt.s32.totalorder (!%p189_p10), %s629_s5, 3  ;;  %672 = vmatprep.subr.bf16.mxu1 (!%p189_p10), %v853_v3  ;;  %v327_v5 = vlaneseq (!%p189_p10)  ;;  %v631_v10 = vld [vmem:[%s1040_s2] ss:$0 sm:$0xff] (!%p189_p10)  ;;  %vm340_vm5 = vcmask (!%p189_p10), 130048  }
  0x12   : > { %654 = vmatpush3.msra.mxu0 (!%p189_p10), %v236_v0  ;;  %662 = vmatprep.mubr.msk.f32.mxu1 (!%p189_p10), %vm854_vm1, %v855_v4  ;;  %s634_s10 = sshll.u32 (!%p189_p10), %s843_s18, 4  ;;  %s950_s13 = sand.u32 (!%p189_p10), 1, %s835_s16  }
  0x13   : > { %675 = vmatprep.subr.bf16.mxu0 (!%p189_p10), %v853_v3  ;;  %v328_v6 = vand.u32 (!%p189_p10), 127, %v327_v5  ;;  %v332_v7 = vstv (!%p189_p10), %s634_s10  ;;  %v330_v8 = vshrl.u32 (!%p189_p10), %v327_v5, 7  ;;  %s627_s14 = sshll.u32 (!%p189_p10), %s950_s13, 3  ;;  %s640_s21 = sshll.u32 (!%p189_p10), %s843_s18, 7 }
  0x14   : > { %s212_s22 = scalar_lea.vmem (!%p189_p10), [#allocation2], %s627_s14  ;;  %s954_s26 = scalar_lea.vmem (!%p189_p10), [#allocation4], %s627_s14 }
  0x15   : > { %v333_v9 = vadd.s32 (!%p189_p10), %v332_v7, %v328_v6  ;;  %vm334_vm2 = vcmp.eq.s32.totalorder (!%p189_p10), %v330_v8, 0  ;;  %s510_s24 = sshll.u32 (!%p189_p10), %s212_s22, 4  ;;  %s523_s29 = sshll.u32 (!%p189_p10), %s954_s26, 4  ;;  %s962_s24 = int_to_ptr.vmem [resolvable:$true] %s510_s24  ;;  %s969_s29 = int_to_ptr.vmem [resolvable:$true] %s523_s29 }
  0x16   : > { %s967_s8 = scalar_lea.hbm (!%p189_p10), %s1042_s4, %s640_s21  ;;  %s741_s10 = scalar_lea.vmem (!%p189_p10), %s962_s24, 128 }
  0x17   : > { %vm335_vm3 = vcmp.lt.s32.totalorder (!%p189_p10), %v333_v9, 32  ;;  %p742_p12 = scmp.ne.s32.totalorder (!%p189_p10), %s962_s24, %s741_s10  ;;  %s856_s11 = smov (!%p189_p10), [#allocation2]  }
  0x18   : > { %s1053_s5 = smov (!%p222_p11, %s629_s5), 3  ;;  %vm336_vm4 = vmand %vm334_vm2, %vm335_vm3  ;;  %s745_s12 = sshll.u32 %s856_s11, 4  ;;  %s746_s12 = int_to_ptr.vmem [resolvable:$false] %s745_s12 }
  0x19   : > { %s630_s6 = sshll.u32 %s1053_s5, 3  ;;  %v635_v19 = vsel %vm336_vm4, 1.0, %v855_v4  ;;  %p743_p13 = pnand %p742_p12, %p923_p4 }
  0x1a   : > { %s225_s9 = scalar_lea.vmem %s1038_s0, %s630_s6  ;;  %s960_s6 = scalar_lea.hbm %s1041_s3, %s640_s21 }
  0x1b   : > { %v234_v1 = vld [vmem:[%s225_s9] sm:$0xff]  ;;  %v235_v2 = vld [vmem:[%s225_s9 + $0x8] sm:$0xff]  ;;  %s492_s9 = scalar_lea.sflag [#allocation3], %s950_s13  ;;  %p744_p0 = pneg %p743_p13 }
  0x1c   : > { %655 = vmatprep.mubr.msk.f32.mxu0 %vm244_vm0, %v234_v1  ;;  %s747_s14 = scalar_lea.vmem %s746_s12, 256  ;;  %p748_p1 = scmp.lt.s32.totalorder %s962_s24, %s746_s12 }
  0x1d   : > { %656 = vmatmul.mubr.msk.f32.vlgmr.msra.gmra.mrb[0].mxu0 %vm244_vm0, %v235_v2  ;;  %p749_p2 = scmp.lt.s32.totalorder %s747_s14, %s741_s10 }
  0x1e   : > { %669 = vmatprep.mubr.msk.f32.mxu0 %vm854_vm1, %v855_v4 }
  0x1f   : > { %p750_p3 = por %p749_p2, %p748_p1 }
  0x21   : > { %p751_p5 = pnand %p750_p3, %p744_p0 }
  0xf0   : > { %v657_v11 = vpop.f32.mrb[0].mxu0 }
  0xf1   : > { %v323_v12 = vadd.f32 %v657_v11, %v631_v10  ;;  %v317_v13 = vpop.f32.mrb[1].mxu0 }
  0xf2   : > { %v318_v14 = vadd.f32 %v631_v10, %v317_v13 }
  0xf3   : > { %v418_v15 = vmul.f32 %v323_v12, %v323_v12 }
  0xf4   : > { %v417_v16 = vmul.f32 %v318_v14, %v318_v14  ;;  %v673_v17 = vpack.c.bf16 %v323_v12, %v318_v14 }
  0xf6   : > { %v676_v18 = vpack.c.bf16 %v418_v15, %v417_v16  ;;  %674 = vmatpush3.bf16.msra.mxu1 %v673_v17 }
  0xf8   : > { %677 = vmatpush3.bf16.msra.mxu0 %v676_v18 }
  0xf9   : > { %663 = vmatmul.mubr.msk.f32.vlgmr.msra.gmra.mrb[0].mxu1 %vm340_vm5, %v635_v19 }
  0xfb   : > { %670 = vmatmul.mubr.msk.f32.vlgmr.msra.gmra.mrb[2].mxu0 %vm340_vm5, %v635_v19 }
 0x1cc   : > { %v410_v20 = vpop.f32.mrb[0].mxu1 }
 0x1cd   : > { %v664_v21 = vpop.f32.mrb[1].mxu1  ;;  %415 = vst [vmem:[%s212_s22] sm:$0xff] %v410_v20 }
 0x1ce   : > { %v485_v22 = vpop.f32.mrb[2].mxu0 }
 0x1cf   : > { %v671_v23 = vpop.f32.mrb[3].mxu0 }
 0x1d0   : > { %754 = shalt.err (!%p751_p5)
}
 0x1d1   : > { %s755_s21 = scalar_lea.hbm %s960_s6, 128  ;;  %s759_s5 = scalar_lea.hbm %s1041_s3, 256 }
 0x1d2   : > { %p756_p6 = scmp.ne.s32.totalorder %s960_s6, %s755_s21  ;;  %p760_p10 = scmp.lt.u32.totalorder %s960_s6, %s1041_s3 }
 0x1d3   : > { %p761_p11 = scmp.lt.u32.totalorder %s759_s5, %s755_s21  ;;  %p763_p13 = scmp.lt.u32.totalorder %s755_s21, %s960_s6 }
 0x1d4   : > { %p757_p7 = pnand %p756_p6, %p923_p4 }
 0x1d5   : > { %p762_p12 = por %p761_p11, %p760_p10 }
 0x1d6   : > { %p758_p9 = pneg %p757_p7 }
 0x1d7   : > { %p764_p0 = por %p763_p13, %p762_p12 }
 0x1d9   : > { %p765_p1 = pnand %p764_p0, %p758_p9 }
 0x1db   : > { %768 = shalt.err (!%p765_p1)
}
 0x1dc   : > { %678 = dma.vmem_to_hbm [thread:$0]  (%p923_p4), %s962_s24, 128, %s960_s6, %s492_s9   ;;  %490 = vst [vmem:[%s954_s26] sm:$0xff] %v485_v22 }
 0x1dd   : > { %s497_s10 = scalar_lea.sflag [#allocation5], %s950_s13  ;;  %s769_s11 = scalar_lea.vmem %s969_s29, 128 }
 0x1de   : > { %p770_p2 = scmp.ne.s32.totalorder %s969_s29, %s769_s11  ;;  %s857_s12 = smov [#allocation4]  }
 0x1df   : > { %s773_s14 = sshll.u32 %s857_s12, 4  ;;  %s774_s14 = int_to_ptr.vmem [resolvable:$false] %s773_s14 }
 0x1e0   : > { %p771_p3 = pnand %p770_p2, %p923_p4  ;;  %s775_s21 = scalar_lea.vmem %s774_s14, 256 }
 0x1e1   : > { %p776_p6 = scmp.lt.s32.totalorder %s969_s29, %s774_s14  ;;  %p777_p7 = scmp.lt.s32.totalorder %s775_s21, %s769_s11 }
 0x1e2   : > { %p772_p5 = pneg %p771_p3 }
 0x1e3   : > { %p778_p9 = por %p777_p7, %p776_p6 }
 0x1e5   : > { %p779_p10 = pnand %p778_p9, %p772_p5 }
 0x1e7   : > { %782 = shalt.err (!%p779_p10)
}
 0x1e8   : > { %s783_s13 = scalar_lea.hbm %s967_s8, 128  ;;  %s787_s6 = scalar_lea.hbm %s1042_s4, 256 }
 0x1e9   : > { %p784_p11 = scmp.ne.s32.totalorder %s967_s8, %s783_s13  ;;  %p788_p0 = scmp.lt.u32.totalorder %s967_s8, %s1042_s4 }
 0x1ea   : > { %p789_p1 = scmp.lt.u32.totalorder %s787_s6, %s783_s13  ;;  %p791_p3 = scmp.lt.u32.totalorder %s783_s13, %s967_s8 }
 0x1eb   : > { %p785_p12 = pnand %p784_p11, %p923_p4 }
 0x1ec   : > { %p790_p2 = por %p789_p1, %p788_p0 }
 0x1ed   : > { %p786_p13 = pneg %p785_p12 }
 0x1ee   : > { %p792_p5 = por %p791_p3, %p790_p2 }
 0x1f0   : > { %p793_p6 = pnand %p792_p5, %p786_p13 }
 0x1f2   : > { %796 = shalt.err (!%p793_p6)
}
 0x1f3   : > { %679 = dma.vmem_to_hbm [thread:$0]  (%p923_p4), %s969_s29, 128, %s967_s8, %s497_s10  }
 0x1f4 PF: > { %p689_p7 = scmp.ge.s32.totalorder %s851_s20, 2  ;;  %s535_s30 = sand.u32 1, %s831_s15  }
 0x1f5   : > { %s536_s5 = scalar_lea.sflag [#allocation3], %s535_s30 }
 0x1f6   : > { %p683_p9 = pnand %p689_p7, %p930_p8 }
 0x1f8   : > { %822 = dma.done.wait (!%p683_p9), %s536_s5, 128  }
 0x1f9   : > { %824 = vsyncadd (!%p683_p9), %s536_s5, 4294967168  ;;  %s545_s18 = scalar_lea.sflag [#allocation5], %s535_s30 }
 0x1fa   : > { %826 = dma.done.wait (!%p683_p9), %s545_s18, 128  }
 0x1fb   : > { %828 = vsyncadd (!%p683_p9), %s545_s18, 4294967168  ;;  %s21_s20 = sadd.s32 1, %s851_s20   ;;  %s1045_s15 = smov %s835_s16 }
 0x1fc   : > { %p18_p10 = scmp.ge.s32.totalorder %s21_s20, 4   ;;  %s1046_s16 = smov %s839_s17 }
 0x1fd   : > { %s1047_s17 = smov %s936_s28  ;;  %s1048_s18 = smov %s847_s19 }
 0x1fe   : > { %s1049_s19 = smov %s1051_s23  ;;  %20 = sbr.rel (!%p18_p10) target bundleno = 6 (0x6), region = 88 }
 0x205   :  { %550 = vsyncpa [#allocation3], 1 }
 0x206   :  { %552 = vsyncpa [#allocation3 + $0x1], 1 }
 0x207   :  { %553 = vsyncpa [#allocation5], 1 }
 0x208   :  { %555 = vsyncpa [#allocation5 + $0x1], 1 }

</bundles_post_ra>
